<compile_context>
chip_gen: v5e
topology: v5e:2x2
jax: 0.10.0
libtpu: 0.0.40
codegen_flags: <defaults>
</compile_context>

<pallas_src>
import functools

import jax
import jax.numpy as jnp
from jax.experimental import pallas as pl
from jax.experimental.pallas import tpu as pltpu


def _attention_block_kernel(w_ref, b_ref, x_ref, o_ref, *, channels, hw):
    # w_ref: (C,)  f32, SMEM      1x1-conv weight
    # b_ref: (1,)  f32, SMEM      conv bias
    # x_ref: (TB, C*HW), VMEM     TB batch rows; channel c occupies lanes
    #                             [c*HW, (c+1)*HW)
    # o_ref: (TB, HW),  VMEM      dense output slab
    #
    # 1x1 conv over channels == per-pixel dot product; with C small this is an
    # unrolled VPU MAC (an M=1 MXU matmul would waste the systolic array and
    # the result-FIFO pop path for zero benefit in an HBM-bound kernel).
    acc = w_ref[0] * x_ref[:, 0:hw].astype(jnp.float32)
    for c in range(1, channels):
        acc = acc + w_ref[c] * x_ref[:, c * hw:(c + 1) * hw].astype(jnp.float32)
    acc = acc + b_ref[0]

    mask = jax.nn.sigmoid(acc)                        # (TB, HW), strictly > 0
    # norm = 2 * ||mask||_1 per batch row; abs is redundant since sigmoid > 0.
    row_sum = jnp.sum(mask, axis=-1, keepdims=True)   # (TB, 1), row-local
    scale = jnp.float32(0.5 * hw) / row_sum           # H*W / (2*sum), exact
    o_ref[...] = (mask * scale).astype(o_ref.dtype)


def _choose_block_b(batch, channels, hw, itemsize):
    """Largest batch tile that keeps the double-buffered input ~8 MiB total
    (fits v5e's 16 MiB scoped-VMEM default; comfortably under v6e/v7x).
    Returned value is either a multiple of 8 (sublane-dense) or == batch
    (full-extent block), so the (8,128) block constraint always holds."""
    per_row_bytes = channels * hw * itemsize
    target_tile_bytes = 4 * 1024 * 1024
    tb = max(1, target_tile_bytes // per_row_bytes)
    if tb >= batch:
        return batch
    tb = max(8, (tb // 8) * 8)
    return int(min(tb, batch))


def attention_block(x, weight, bias, *, block_b=None):
    """x: (B, C, H, W); weight: (1, C) or (1, C, 1, 1); bias: (1,).
    Returns (B, 1, H, W) with the dtype of x."""
    B, C, H, W = x.shape
    HW = H * W

    # Free reshape: batch -> sublanes, (channel, pixel) -> lanes.
    x_flat = x.reshape(B, C * HW)
    w = weight.reshape(C).astype(jnp.float32)
    b = bias.reshape(1).astype(jnp.float32)

    if block_b is None:
        block_b = _choose_block_b(B, C, HW, jnp.dtype(x.dtype).itemsize)
    grid = pl.cdiv(B, block_b)

    kernel = functools.partial(_attention_block_kernel, channels=C, hw=HW)

    out_flat = pl.pallas_call(
        kernel,
        out_shape=jax.ShapeDtypeStruct((B, HW), x.dtype),
        grid_spec=pltpu.PrefetchScalarGridSpec(
            num_scalar_prefetch=0,
            grid=(grid,),
            in_specs=[
                # small parameters live in SMEM, read as scalars in the MAC
                pl.BlockSpec(memory_space=pltpu.MemorySpace.SMEM),   # weight
                pl.BlockSpec(memory_space=pltpu.MemorySpace.SMEM),   # bias
                # streamed batch tile of x
                pl.BlockSpec((block_b, C * HW), lambda i: (i, 0)),
            ],
            out_specs=pl.BlockSpec((block_b, HW), lambda i: (i, 0)),
        ),
        compiler_params=pltpu.CompilerParams(
            dimension_semantics=("parallel",),   # batch tiles shard across TCs
        ),
    )(w, b, x_flat)

    return out_flat.reshape(B, 1, H, W)


def _reference(x, weight, bias):
    # Plain-JAX reference mirroring the PyTorch forward.
    B, C, H, W = x.shape
    logits = jnp.einsum("bchw,c->bhw", x, weight.reshape(C)) + bias.reshape(())
    mask = jax.nn.sigmoid(logits)[:, None, :, :]               # (B,1,H,W)
    norm = 2.0 * jnp.sum(jnp.abs(mask), axis=(1, 2, 3))        # (B,)
    return mask * H * W / norm.reshape(B, 1, 1, 1)


if __name__ == "__main__":
    key = jax.random.PRNGKey(0)
    kx, kw, kb = jax.random.split(key, 3)

    B, C, H, W = 2, 4, 16, 16
    x = jax.random.normal(kx, (B, C, H, W), dtype=jnp.float32)

    # Conv2d(in_channels=C, out_channels=1, kernel_size=1) parameters:
    # torch weight (1, C, 1, 1) -> (1, C) here; bias (1,).
    fan_in = C  # kernel_size = 1
    bound = 1.0 / (fan_in ** 0.5)
    weight = jax.random.uniform(kw, (1, C), minval=-bound, maxval=bound,
                                dtype=jnp.float32)
    bias = jax.random.uniform(kb, (1,), minval=-bound, maxval=bound,
                              dtype=jnp.float32)

    out = attention_block(x, weight, bias)
    out = jax.block_until_ready(out)

    ref = _reference(x, weight, bias)
    assert out.shape == (B, 1, H, W)
    assert jnp.allclose(out, ref, atol=1e-5, rtol=1e-5), (
        f"max abs err = {jnp.max(jnp.abs(out - ref))}")

    print("KERNEL_OK")
</pallas_src>

<mosaic_0001>
module attributes {stable_mosaic.version = 11 : i64} {
  func.func @_attention_block_kernel(%arg0: i32, %arg1: memref<4xf32, #tpu.memory_space<smem>>, %arg2: memref<1xf32, #tpu.memory_space<smem>>, %arg3: memref<2x1024xf32, #tpu.memory_space<vmem>>, %arg4: memref<2x256xf32, #tpu.memory_space<vmem>>) attributes {dimension_semantics = [#tpu.dimension_semantics<parallel>], iteration_bounds = array<i64: 1>, scalar_prefetch = 0 : i64, scratch_operands = 0 : i64, tpu.core_type = #tpu.core_type<tc>, window_params = [{transform_indices = @transform_0, window_bounds = array<i64: 4>}, {transform_indices = @transform_1, window_bounds = array<i64: 1>}, {transform_indices = @transform_2, window_bounds = array<i64: 2, 1024>}, {transform_indices = @transform_3, window_bounds = array<i64: 2, 256>}]} {
    %c0 = arith.constant 0 : index
    %0 = memref.load %arg1[%c0] : memref<4xf32, #tpu.memory_space<smem>>
    %c0_0 = arith.constant 0 : index
    %c0_1 = arith.constant 0 : index
    %1 = vector.load %arg3[%c0_0, %c0_1] : memref<2x1024xf32, #tpu.memory_space<vmem>>, vector<2x256xf32>
    %2 = vector.broadcast %0 : f32 to vector<2x256xf32>
    %3 = arith.mulf %2, %1 : vector<2x256xf32>
    %c1 = arith.constant 1 : index
    %4 = memref.load %arg1[%c1] : memref<4xf32, #tpu.memory_space<smem>>
    %c0_2 = arith.constant 0 : index
    %c256 = arith.constant 256 : index
    %5 = vector.load %arg3[%c0_2, %c256] : memref<2x1024xf32, #tpu.memory_space<vmem>>, vector<2x256xf32>
    %6 = vector.broadcast %4 : f32 to vector<2x256xf32>
    %7 = arith.mulf %6, %5 : vector<2x256xf32>
    %8 = arith.addf %3, %7 : vector<2x256xf32>
    %c2 = arith.constant 2 : index
    %9 = memref.load %arg1[%c2] : memref<4xf32, #tpu.memory_space<smem>>
    %c0_3 = arith.constant 0 : index
    %c512 = arith.constant 512 : index
    %10 = vector.load %arg3[%c0_3, %c512] : memref<2x1024xf32, #tpu.memory_space<vmem>>, vector<2x256xf32>
    %11 = vector.broadcast %9 : f32 to vector<2x256xf32>
    %12 = arith.mulf %11, %10 : vector<2x256xf32>
    %13 = arith.addf %8, %12 : vector<2x256xf32>
    %c3 = arith.constant 3 : index
    %14 = memref.load %arg1[%c3] : memref<4xf32, #tpu.memory_space<smem>>
    %c0_4 = arith.constant 0 : index
    %c768 = arith.constant 768 : index
    %15 = vector.load %arg3[%c0_4, %c768] : memref<2x1024xf32, #tpu.memory_space<vmem>>, vector<2x256xf32>
    %16 = vector.broadcast %14 : f32 to vector<2x256xf32>
    %17 = arith.mulf %16, %15 : vector<2x256xf32>
    %18 = arith.addf %13, %17 : vector<2x256xf32>
    %c0_5 = arith.constant 0 : index
    %19 = memref.load %arg2[%c0_5] : memref<1xf32, #tpu.memory_space<smem>>
    %20 = vector.broadcast %19 : f32 to vector<2x256xf32>
    %21 = arith.addf %18, %20 : vector<2x256xf32>
    %22 = arith.negf %21 : vector<2x256xf32>
    %23 = math.exp %22 : vector<2x256xf32>
    %cst = arith.constant 1.000000e+00 : f32
    %24 = vector.broadcast %cst : f32 to vector<2x256xf32>
    %25 = arith.addf %24, %23 : vector<2x256xf32>
    %26 = arith.divf %24, %25 : vector<2x256xf32>
    %cst_6 = arith.constant dense<0.000000e+00> : vector<2xf32>
    %27 = vector.multi_reduction <add>, %26, %cst_6 [1] : vector<2x256xf32> to vector<2xf32>
    %28 = vector.shape_cast %27 : vector<2xf32> to vector<2x1xf32>
    %cst_7 = arith.constant 1.280000e+02 : f32
    %29 = vector.broadcast %cst_7 : f32 to vector<2x1xf32>
    %30 = arith.divf %29, %28 : vector<2x1xf32>
    %31 = vector.broadcast %30 : vector<2x1xf32> to vector<2x256xf32>
    %32 = arith.mulf %26, %31 : vector<2x256xf32>
    %c0_8 = arith.constant 0 : index
    %c0_9 = arith.constant 0 : index
    %33 = vector.load %arg4[%c0_8, %c0_9] : memref<2x256xf32, #tpu.memory_space<vmem>>, vector<2x256xf32>
    tpu.vector_store %arg4[%c0_8, %c0_9], %32 {strides = array<i32>} : memref<2x256xf32, #tpu.memory_space<vmem>>, vector<2x256xf32>,
    return
  }
  func.func @transform_0(%arg0: i32) -> i32 {
    %c0_i32 = arith.constant 0 : i32
    %c0_i32_0 = arith.constant 0 : i32
    return %c0_i32 : i32
  }
  func.func @transform_1(%arg0: i32) -> i32 {
    %c0_i32 = arith.constant 0 : i32
    %c0_i32_0 = arith.constant 0 : i32
    return %c0_i32 : i32
  }
  func.func @transform_2(%arg0: i32) -> (i32, i32) {
    %c0_i32 = arith.constant 0 : i32
    %c0_i32_0 = arith.constant 0 : i32
    return %arg0, %c0_i32 : i32, i32
  }
  func.func @transform_3(%arg0: i32) -> (i32, i32) {
    %c0_i32 = arith.constant 0 : i32
    %c0_i32_0 = arith.constant 0 : i32
    return %arg0, %c0_i32 : i32, i32
  }
}

</mosaic_0001>

<bundles_post_ra>
// kernel: tpu_custom_call.1
= control target key start
LH: loop header
LB: loop body
LE: loop exit
PB: predicated region body
PF: predicated region fallthrough
CT: control target
= control target key end

     0   :  { %9 = vsyncpa [#allocation6], 0  ;;  %s253_s0 = inlined_call_operand.vmem [shape: f32[4], index: 0, kind: input, shape index: {}]   ;;  %s254_s1 = inlined_call_operand.<no memory space> [shape: f32[1], index: 1, kind: input, shape index: {}]   ;;  %s255_s2 = inlined_call_operand.hbm [shape: f32[2,1024], index: 2, kind: input, shape index: {}]   ;;  %s256_s3 = inlined_call_operand.hbm [shape: f32[2,256], index: 3, kind: output, shape index: {}]  }
   0x1   :  { %10 = vsyncpa [#allocation4], 0 }
   0x2   :  { %11 = vsyncpa [#allocation5], 0  ;;  %s17_s14 = sshll.u32 %s253_s0, 4  ;;  %s28_s17 = sshll.u32 %s255_s2, 4  ;;  %s18_s14 = int_to_ptr.vmem [resolvable:$true] %s17_s14  ;;  %s29_s17 = int_to_ptr.hbm [resolvable:$true] %s28_s17 }
   0x3   :  { %s217_s18 = smov [#allocation3]   ;;  %s218_s19 = smov [#allocation7]  }
   0x4   :  { %20 = dma.vmem_to_smem %s18_s14, 16, %s217_s18, [#allocation6]  }
   0x5   :  { %s30_s20 = sshll.u32 %s218_s19, 4  ;;  %s31_s20 = int_to_ptr.vmem [resolvable:$true] %s30_s20 }
   0x6   :  { %33 = dma.hbm_to_vmem [thread:$0]  %s29_s17, 256, %s31_s20, [#allocation4]  }
   0x7   :  { %211 = dma.done.wait [#allocation6], 16  }
   0x8   :  { %212 = vsyncadd [#allocation6], 4294967280 }
   0x9   :  { %213 = dma.done.wait [#allocation4], 256  }
   0xa   :  { %214 = vsyncadd [#allocation4], 4294967040 }
   0xb   :  { %42 = sfence }
   0xc   :  { %s43_s21 = sld [smem:[#allocation3]]  ;;  %v44_v0 = vld [vmem:[#allocation7] sm:$0xf]  ;;  %v48_v1 = vld [vmem:[#allocation7 + $0x4] sm:$0xf]  ;;  %v63_v14 = vstv %s254_s1  ;;  %vm90_vm4 = vcmask 1041408  }
   0xd   :  { %s137_s22 = sld [smem:[#allocation3 + $0x1]]  ;;  %v53_v3 = vld [vmem:[#allocation7 + $0x8] sm:$0xf]  ;;  %v58_v6 = vld [vmem:[#allocation7 + $0xc] sm:$0xf]  ;;  %s220_s1 = smov [#allocation8]  }
   0xe   :  { %s138_s0 = sld [smem:[#allocation3 + $0x2]]  ;;  %v219_v42 = vmov 269488144   ;;  %s124_s25 = sshll.u32 %s220_s1, 4  ;;  %s125_s25 = int_to_ptr.vmem [resolvable:$true] %s124_s25 }
   0xf   :  { %s139_s23 = sld [smem:[#allocation3 + $0x3]]  ;;  %v113_v43 = vunpack.c.l.s4 %v219_v42  ;;  %s126_s28 = sshll.u32 %s256_s3, 4  ;;  %s127_s28 = int_to_ptr.hbm [resolvable:$true] %s126_s28 }
  0x11   :  { %v114_v47 = vunpack.c.0.s8 %v113_v43 }
  0x12   :  { %v45_v2 = vstv %s43_s21 }
  0x13   :  { %v46_v4 = vmul.f32 %v45_v2, %v44_v0  ;;  %v49_v5 = vstv %s137_s22 }
  0x14   :  { %v50_v7 = vmul.f32 %v49_v5, %v48_v1  ;;  %v54_v8 = vstv %s138_s0 }
  0x15   :  { %v55_v9 = vmul.f32 %v54_v8, %v53_v3  ;;  %v59_v10 = vstv %s139_s23 }
  0x16   :  { %v51_v11 = vadd.f32 %v50_v7, %v46_v4  ;;  %v60_v12 = vmul.f32 %v59_v10, %v58_v6 }
  0x18   :  { %v56_v13 = vadd.f32 %v55_v9, %v51_v11 }
  0x1a   :  { %v61_v15 = vadd.f32 %v60_v12, %v56_v13 }
  0x1c   :  { %v64_v16 = vadd.f32 %v63_v14, %v61_v15 }
  0x1e   :  { %v140_v17 = vmul.f32 -1.442695, %v64_v16 }
  0x20   :  { %145 = vpow2.f32 %v140_v17 }
  0x26   :  { %v146_v18 = vpop.eup %145 }
  0x27   :  { %v68_v19 = vadd.f32 1.0, %v146_v18 }
  0x29   :  { %147 = vrcp.f32 %v68_v19  ;;  %v80_v22 = vand.u32 2147483648, %v68_v19  ;;  %vm74_vm0 = vweird.f32 %v68_v19  ;;  %v78_v24 = vand.u32 2147483647, %v68_v19 }
  0x2b   :  { %v81_v26 = vor.u32 1.1754944e-38, %v80_v22  ;;  %vm79_vm3 = vcmp.eq.f32.partialorder %v78_v24, 8.507059e+37 }
  0x2f   :  { %v148_v20 = vpop.eup %147 }
  0x30   :  { %v70_v21 = vmul.f32 %v148_v20, %v68_v19  ;;  %vm75_vm1 = vweird.f32 %v148_v20 }
  0x31   :  { %vm76_vm2 = vmor %vm74_vm0, %vm75_vm1 }
  0x32   :  { %v71_v23 = vsub.f32 1.0, %v70_v21 }
  0x34   :  { %v72_v25 = vmul.f32 %v148_v20, %v71_v23 }
  0x36   :  { %v73_v27 = vadd.f32 %v148_v20, %v72_v25 }
  0x38   :  { %v77_v28 = vsel %vm76_vm2, %v148_v20, %v73_v27 }
  0x39   :  { %v82_v29 = vsel %vm79_vm3, %v81_v26, %v77_v28 }
  0x3a   :  { %85 = vst [vmem:[#allocation1] ss:$4 sm:$0xff] %v82_v29 }
  0x41   :  { %v86_v30 = vld.sshfl [vmem:[#allocation1] sm:$0xff pattern:$0x73625140]  ;;  %v87_v31 = vld.sshfl [vmem:[#allocation1 + $0x8] sm:$0xff pattern:$0x73625140] }
  0x42   :  { %v91_v32 = vsel %vm90_vm4, %v86_v30, 0.0  ;;  %v92_v33 = vsel %vm90_vm4, %v87_v31, 0.0 }
  0x43   :  { %v93_v34 = vadd.f32 %v92_v33, %v91_v32 }
  0x45   :  { %94 = vadd.xlane.f32.xlu0 %v93_v34 }
  0xb8   :  { %v95_v35 = vpop.xlane.xlu0 %94 }
  0xb9   :  { %149 = vrcp.f32 %v95_v35  ;;  %v107_v39 = vand.u32 2147483648, %v95_v35  ;;  %v105_v41 = vand.u32 2147483647, %v95_v35  ;;  %vm101_vm6 = vweird.f32 %v95_v35 }
  0xbb   :  { %v108_v45 = vor.u32 1.1754944e-38, %v107_v39  ;;  %vm106_vm8 = vcmp.eq.f32.partialorder %v105_v41, 8.507059e+37 }
  0xbf   :  { %v150_v36 = vpop.eup %149 }
  0xc0   :  { %v97_v37 = vmul.f32 %v150_v36, %v95_v35  ;;  %vm102_vm5 = vweird.f32 %v150_v36 }
  0xc1   :  { %vm103_vm7 = vmor %vm101_vm6, %vm102_vm5 }
  0xc2   :  { %v98_v38 = vsub.f32 1.0, %v97_v37 }
  0xc4   :  { %v99_v40 = vmul.f32 %v150_v36, %v98_v38 }
  0xc6   :  { %v100_v44 = vadd.f32 %v150_v36, %v99_v40 }
  0xc8   :  { %v104_v46 = vsel %vm103_vm7, %v150_v36, %v100_v44 }
  0xc9   :  { %v109_v48 = vsel %vm106_vm8, %v108_v45, %v104_v46 }
  0xca   :  { %v110_v49 = vmul.f32 128.0, %v109_v48 }
  0xcc   :  { %v115_v50 = vperm.slane %v110_v49, %v114_v47 }
  0xce   :  { %v117_v51 = vmul.f32 %v115_v50, %v82_v29 }
  0xd0   :  { %118 = vst [vmem:[#allocation8] sm:$0xf] %v117_v51 }
  0xd1   :  { %129 = dma.vmem_to_hbm [thread:$0]  %s125_s25, 64, %s127_s28, [#allocation5]  }
  0xd2   :  { %215 = dma.done.wait [#allocation5], 64  }
  0xd3   :  { %216 = vsyncadd [#allocation5], 4294967232 }
  0xd4   :  { %134 = vsyncpa [#allocation4], 1 }
  0xd5   :  { %135 = vsyncpa [#allocation5], 1 }
  0xd6   :  { %136 = vsyncpa [#allocation6], 1 }

</bundles_post_ra>
